<compile_context>
chip_gen: v5e
topology: v5e:2x2
jax: 0.10.0
libtpu: 0.0.40
codegen_flags: <defaults>
</compile_context>

<pallas_src>
import numpy as np
import jax
import jax.numpy as jnp
from jax import lax
from jax.experimental import pallas as pl
from jax.experimental.pallas import tpu as pltpu


def _round_up(a, b):
    return (a + b - 1) // b * b


def _vmem_capacity_bytes():
    try:
        cap = int(getattr(pltpu.get_tpu_info(), "vmem_capacity_bytes", 0))
        if cap > 0:
            return cap
    except Exception:
        pass
    return 64 * 1024 * 1024  # conservative (v7x-sized) fallback


def _num_tensorcores():
    """Best-effort TensorCore count per device; defaults to 1 if unknown."""
    try:
        info = pltpu.get_tpu_info()
        for name in ("num_cores", "core_count", "num_tensorcores",
                     "tensorcore_count", "num_cores_per_chip", "cores_per_chip"):
            v = getattr(info, name, None)
            if isinstance(v, (int, np.integer)) and not isinstance(v, bool):
                v = int(v)
                if 1 <= v <= 8:
                    return v
    except Exception:
        pass
    return 1


def _make_club_kernel(tb, rows, inner_n, needs_mask):
    """grid = (core_split 'parallel', row_blocks 'arbitrary'); sums (y - yp)^2."""

    def kernel(y_ref, yp_ref, out_ref, acc_ref):
        c = pl.program_id(0)          # core-split axis
        i = pl.program_id(1)          # row-block (reduction) axis

        @pl.when(i == 0)
        def _init():
            acc_ref[...] = jnp.zeros_like(acc_ref)

        # Cast BEFORE subtracting: bf16/fp8 subtraction of nearby values loses
        # mantissa; f32 VPU math is free on a memory-bound kernel.
        a = y_ref[...].astype(jnp.float32)
        b = yp_ref[...].astype(jnp.float32)
        d = a - b
        sq = d * d

        if needs_mask:
            # Unclamped global row ids: tail rows of a partial block and any
            # clamped (duplicate) grid slot land at row_id >= rows -> masked.
            row0 = (c * inner_n + i) * tb
            rid = row0 + lax.broadcasted_iota(jnp.int32, (tb, 1), 0)
            sq = jnp.where(rid < rows, sq, 0.0)

        acc_ref[...] += sq            # VPU add; no per-step cross-lane reduce

        @pl.when(i == pl.num_programs(1) - 1)
        def _finalize():
            part = jnp.sum(acc_ref[...])          # one XLU reduce per core slice
            out_ref[...] = jnp.broadcast_to(part, out_ref.shape)

    return kernel


def club_forward(x, y, key=None, perm=None, *, block_bytes=None, core_split=None):
    """JAX/Pallas equivalent of CLUB.forward(x, y).

    `x` is accepted (and ignored) to mirror the PyTorch signature — the
    reference forward never reads it.  torch.randperm is replaced by
    jax.random.permutation (pass `key`, or an explicit `perm` for testing).
    `block_bytes` / `core_split` are tuning/test overrides.
    """
    del x                                     # unused by the reference forward
    assert y.ndim >= 2, "y must be (batch, ..., features)"
    bs = y.shape[0]
    if perm is None:
        if key is None:
            key = jax.random.PRNGKey(0)
        perm = jax.random.permutation(key, bs)

    # mean(...) in the reference is over all leading (non-feature) dims.
    denom = 1
    for s in y.shape[:-1]:
        denom *= int(s)
    y2 = y.reshape(bs, -1) if y.ndim > 2 else y

    # One XLA gather materializes y[perm] (see TODO at top about in-kernel gather).
    yp2 = jnp.take(y2, perm, axis=0)

    rows, cols = y2.shape
    itemsize = jnp.dtype(y2.dtype).itemsize
    sublane = max(8, 32 // max(itemsize, 1))        # 8 f32 / 16 bf16 / 32 int8-fp8
    row_bytes = cols * itemsize

    # ---- byte-based row tile (~1-4 MiB per input block), generation aware ----
    vmem_cap = _vmem_capacity_bytes()
    if block_bytes is None:
        block_bytes = min(4 << 20, max(512 << 10, (vmem_cap // 2) // 6))
    tb = max(sublane, (int(block_bytes) // row_bytes) // sublane * sublane)
    tb = min(tb, _round_up(rows, sublane))
    n_blocks = -(-rows // tb)

    # ---- optional 2-way split of the row axis across TensorCores -------------
    ncores = _num_tensorcores()
    if core_split is not None:
        split = max(1, int(core_split)) if n_blocks >= 2 else 1
    elif n_blocks >= 2 and (ncores >= 2 or n_blocks % 2 == 0 or n_blocks >= 8):
        split = 2
    else:
        split = 1
    inner_n = -(-n_blocks // split)
    slots = split * inner_n
    needs_mask = (slots * tb) != rows

    def in_map(c, i):
        # Clamp so slots past the last row block re-read a valid block; their
        # contribution is zeroed by the unclamped row-id mask in the kernel.
        return (jnp.minimum(c * inner_n + i, n_blocks - 1), 0)

    acc_bytes = tb * cols * 4
    work_bytes = 4 * tb * cols * itemsize + acc_bytes + 2 * 8 * 128 * 4
    vmem_limit = int(min(max(work_bytes + (2 << 20), 8 << 20),
                         max(vmem_cap - (4 << 20), 8 << 20)))

    kernel = _make_club_kernel(tb, rows, inner_n, needs_mask)

    out = pl.pallas_call(
        kernel,
        out_shape=jax.ShapeDtypeStruct((split * 8, 128), jnp.float32),
        grid=(split, inner_n),
        in_specs=[
            pl.BlockSpec((tb, cols), in_map),
            pl.BlockSpec((tb, cols), in_map),
        ],
        out_specs=pl.BlockSpec((8, 128), lambda c, i: (c, 0)),
        scratch_shapes=[pltpu.VMEM((tb, cols), jnp.float32)],
        compiler_params=pltpu.CompilerParams(
            dimension_semantics=("parallel", "arbitrary"),
            vmem_limit_bytes=vmem_limit,
        ),
        cost_estimate=pl.CostEstimate(
            flops=3 * rows * cols,
            transcendentals=0,
            bytes_accessed=2 * rows * cols * itemsize + split * 8 * 128 * 4,
        ),
    )(y2, yp2)

    partials = out[::8, 0]                       # one partial sum per core slice
    return jnp.sum(partials) * jnp.float32(0.5 / denom)


def club_forward_ref(y_np_f32, perm_np):
    """Numpy reference mirroring the PyTorch code literally (given the perm)."""
    positive = np.zeros_like(y_np_f32)
    negative = -((y_np_f32 - y_np_f32[perm_np]) ** 2) / 2.0
    return float((positive.sum(-1) - negative.sum(-1)).mean())


if __name__ == "__main__":
    root = jax.random.PRNGKey(0)

    def run_case(bs, dim, dtype, block_bytes=None, core_split=None, seed_off=0):
        kx, ky, kp = jax.random.split(jax.random.fold_in(root, seed_off), 3)
        x = jax.random.normal(kx, (bs, dim), dtype=jnp.float32).astype(dtype)
        y = jax.random.normal(ky, (bs, dim), dtype=jnp.float32).astype(dtype)
        perm = jax.random.permutation(kp, bs)

        out = club_forward(x, y, perm=perm,
                           block_bytes=block_bytes, core_split=core_split)
        out = float(jax.block_until_ready(out))

        ref = club_forward_ref(np.asarray(y.astype(jnp.float32)), np.asarray(perm))
        assert abs(out - ref) <= 1e-3 + 1e-3 * abs(ref), (bs, dim, str(dtype), out, ref)

    # Primary small case (matches the module's (batch, hidden) usage).
    run_case(8, 128, jnp.float32, seed_off=0)
    # Tail-masked partial block + non-multiple-of-128 feature dim.
    run_case(13, 96, jnp.float32, seed_off=1)
    # Multi-block grid + forced 2-way core split + tail mask (tiny blocks).
    run_case(100, 128, jnp.float32, block_bytes=16 * 1024, core_split=2, seed_off=2)
    # Odd block count with forced core split -> exercises the clamped OOB slot.
    run_case(72, 128, jnp.float32, block_bytes=16 * 1024, core_split=2, seed_off=3)
    # bf16 inputs (16-row sublane packing) with f32 in-kernel accumulation.
    run_case(24, 256, jnp.bfloat16, seed_off=4)

    print("KERNEL_OK")
</pallas_src>

<mosaic_0001>
module attributes {stable_mosaic.version = 11 : i64} {
  func.func @kernel(%arg0: i32, %arg1: i32, %arg2: memref<8x128xf32, #tpu.memory_space<vmem>>, %arg3: memref<8x128xf32, #tpu.memory_space<vmem>>, %arg4: memref<8x128xf32, #tpu.memory_space<vmem>>, %arg5: memref<8x128xf32, #tpu.memory_space<vmem>>) attributes {dimension_semantics = [#tpu.dimension_semantics<parallel>, #tpu.dimension_semantics<arbitrary>], iteration_bounds = array<i64: 1, 1>, scalar_prefetch = 0 : i64, scratch_operands = 1 : i64, tpu.core_type = #tpu.core_type<tc>, window_params = [{transform_indices = @transform_0, window_bounds = array<i64: 8, 128>}, {transform_indices = @transform_1, window_bounds = array<i64: 8, 128>}, {transform_indices = @transform_2, window_bounds = array<i64: 8, 128>}]} {
    %c0_i32 = arith.constant 0 : i32
    %0 = arith.cmpi eq, %arg1, %c0_i32 : i32
    %1 = arith.extui %0 : i1 to i32
    %c0_i32_0 = arith.constant 0 : i32
    %2 = arith.cmpi ne, %1, %c0_i32_0 : i32
    scf.if %2 {
      %cst = arith.constant 0.000000e+00 : f32
      %13 = vector.broadcast %cst : f32 to vector<8x128xf32>
      %c0_10 = arith.constant 0 : index
      %c0_11 = arith.constant 0 : index
      %14 = vector.load %arg5[%c0_10, %c0_11] : memref<8x128xf32, #tpu.memory_space<vmem>>, vector<8x128xf32>
      tpu.vector_store %arg5[%c0_10, %c0_11], %13 {strides = array<i32>} : memref<8x128xf32, #tpu.memory_space<vmem>>, vector<8x128xf32>,
    } else {
    }
    %c0 = arith.constant 0 : index
    %c0_1 = arith.constant 0 : index
    %3 = vector.load %arg2[%c0, %c0_1] : memref<8x128xf32, #tpu.memory_space<vmem>>, vector<8x128xf32>
    %c0_2 = arith.constant 0 : index
    %c0_3 = arith.constant 0 : index
    %4 = vector.load %arg3[%c0_2, %c0_3] : memref<8x128xf32, #tpu.memory_space<vmem>>, vector<8x128xf32>
    %5 = arith.subf %3, %4 : vector<8x128xf32>
    %6 = arith.mulf %5, %5 : vector<8x128xf32>
    %c0_4 = arith.constant 0 : index
    %c0_5 = arith.constant 0 : index
    %7 = vector.load %arg5[%c0_4, %c0_5] : memref<8x128xf32, #tpu.memory_space<vmem>>, vector<8x128xf32>
    %8 = arith.addf %7, %6 : vector<8x128xf32>
    %c0_6 = arith.constant 0 : index
    %c0_7 = arith.constant 0 : index
    %9 = vector.load %arg5[%c0_6, %c0_7] : memref<8x128xf32, #tpu.memory_space<vmem>>, vector<8x128xf32>
    tpu.vector_store %arg5[%c0_6, %c0_7], %8 {strides = array<i32>} : memref<8x128xf32, #tpu.memory_space<vmem>>, vector<8x128xf32>,
    %c0_i32_8 = arith.constant 0 : i32
    %10 = arith.cmpi eq, %arg1, %c0_i32_8 : i32
    %11 = arith.extui %10 : i1 to i32
    %c0_i32_9 = arith.constant 0 : i32
    %12 = arith.cmpi ne, %11, %c0_i32_9 : i32
    scf.if %12 {
      %c0_10 = arith.constant 0 : index
      %c0_11 = arith.constant 0 : index
      %13 = vector.load %arg5[%c0_10, %c0_11] : memref<8x128xf32, #tpu.memory_space<vmem>>, vector<8x128xf32>
      %14 = vector.shape_cast %13 : vector<8x128xf32> to vector<1x8x128xf32>
      %cst = arith.constant dense<0.000000e+00> : vector<1xf32>
      %15 = vector.multi_reduction <add>, %14, %cst [1, 2] : vector<1x8x128xf32> to vector<1xf32>
      %16 = vector.shape_cast %15 : vector<1xf32> to vector<1x1x1xf32>
      %17 = vector.extract %16[0, 0, 0] : f32 from vector<1x1x1xf32>
      %18 = vector.broadcast %17 : f32 to vector<8x128xf32>
      %c0_12 = arith.constant 0 : index
      %c0_13 = arith.constant 0 : index
      %19 = vector.load %arg4[%c0_12, %c0_13] : memref<8x128xf32, #tpu.memory_space<vmem>>, vector<8x128xf32>
      tpu.vector_store %arg4[%c0_12, %c0_13], %18 {strides = array<i32>} : memref<8x128xf32, #tpu.memory_space<vmem>>, vector<8x128xf32>,
    } else {
    }
    return
  }
  func.func @transform_0(%arg0: i32, %arg1: i32) -> (i32, i32) {
    %c1_i32 = arith.constant 1 : i32
    %0 = arith.muli %arg0, %c1_i32 : i32
    %1 = arith.addi %0, %arg1 : i32
    %c0_i32 = arith.constant 0 : i32
    %2 = arith.minsi %1, %c0_i32 : i32
    %c0_i32_0 = arith.constant 0 : i32
    %c0_i32_1 = arith.constant 0 : i32
    return %2, %c0_i32_0 : i32, i32
  }
  func.func @transform_1(%arg0: i32, %arg1: i32) -> (i32, i32) {
    %c1_i32 = arith.constant 1 : i32
    %0 = arith.muli %arg0, %c1_i32 : i32
    %1 = arith.addi %0, %arg1 : i32
    %c0_i32 = arith.constant 0 : i32
    %2 = arith.minsi %1, %c0_i32 : i32
    %c0_i32_0 = arith.constant 0 : i32
    %c0_i32_1 = arith.constant 0 : i32
    return %2, %c0_i32_0 : i32, i32
  }
  func.func @transform_2(%arg0: i32, %arg1: i32) -> (i32, i32) {
    %c0_i32 = arith.constant 0 : i32
    %c0_i32_0 = arith.constant 0 : i32
    return %arg0, %c0_i32 : i32, i32
  }
}

</mosaic_0001>

<bundles_post_ra>
// kernel: tpu_custom_call.1
= control target key start
LH: loop header
LB: loop body
LE: loop exit
PB: predicated region body
PF: predicated region fallthrough
CT: control target
= control target key end

     0   :  { %7 = vsyncpa [#allocation4], 0  ;;  %s215_s0 = inlined_call_operand.hbm [shape: f32[8,128], index: 0, kind: input, shape index: {}]   ;;  %s216_s1 = inlined_call_operand.hbm [shape: f32[8,128], index: 1, kind: input, shape index: {}]   ;;  %s217_s2 = inlined_call_operand.hbm [shape: f32[8,128], index: 2, kind: output, shape index: {}]  }
   0x1   :  { %8 = vsyncpa [#allocation7], 0 }
   0x2   :  { %9 = vsyncpa [#allocation5], 0  ;;  %s20_s11 = sshll.u32 %s215_s0, 4  ;;  %s188_s12 = smov [#allocation3]   ;;  %s21_s11 = int_to_ptr.hbm [resolvable:$true] %s20_s11 }
   0x3   :  { %s22_s13 = sshll.u32 %s188_s12, 4  ;;  %s36_s16 = sshll.u32 %s216_s1, 4  ;;  %s23_s13 = int_to_ptr.vmem [resolvable:$true] %s22_s13  ;;  %s37_s16 = int_to_ptr.hbm [resolvable:$true] %s36_s16 }
   0x4   :  { %25 = dma.hbm_to_vmem [thread:$0]  %s21_s11, 128, %s23_s13, [#allocation4]  }
   0x5   :  { %s189_s17 = smov [#allocation6]  }
   0x6   :  { %s38_s18 = sshll.u32 %s189_s17, 4  ;;  %s39_s18 = int_to_ptr.vmem [resolvable:$true] %s38_s18 }
   0x7   :  { %41 = dma.hbm_to_vmem [thread:$0]  %s37_s16, 128, %s39_s18, [#allocation7]  }
   0x8   :  { %182 = dma.done.wait [#allocation4], 128  }
   0x9   :  { %183 = vsyncadd [#allocation4], 4294967168 }
   0xa   :  { %184 = dma.done.wait [#allocation7], 128  }
   0xb   :  { %185 = vsyncadd [#allocation7], 4294967168  ;;  %v61_v0 = vld [vmem:[#allocation3] sm:$0xff]  ;;  %v62_v1 = vld [vmem:[#allocation6] sm:$0xff]  ;;  %s190_s0 = smov [#allocation8]   ;;  %s90_s21 = sshll.u32 %s217_s2, 4  ;;  %s91_s21 = int_to_ptr.hbm [resolvable:$true] %s90_s21 }
   0xc   :  { %v63_v2 = vsub.f32 %v61_v0, %v62_v1  ;;  %s88_s1 = sshll.u32 %s190_s0, 4  ;;  %s89_s1 = int_to_ptr.vmem [resolvable:$true] %s88_s1 }
   0xe   :  { %v64_v3 = vmul.f32 %v63_v2, %v63_v2 }
  0x10   :  { %72 = vadd.xlane.f32.xlu0 %v64_v3 }
  0x83   :  { %v73_v4 = vpop.xlane.xlu0 %72 }
  0x84   :  { %v74_v5 = vrot.slane %v73_v4, 4 }
  0x86   :  { %v75_v6 = vadd.f32 %v74_v5, %v73_v4 }
  0x88   :  { %v76_v7 = vrot.slane %v75_v6, 2 }
  0x8a   :  { %v77_v8 = vadd.f32 %v76_v7, %v75_v6 }
  0x8c   :  { %v78_v9 = vrot.slane %v77_v8, 1 }
  0x8e   :  { %v79_v10 = vadd.f32 %v78_v9, %v77_v8 }
  0x90   :  { %105 = vpush %v79_v10 }
  0xc1   :  { %s106_s22 = spop %105 }
  0xc2   :  { %v81_v11 = vstv %s106_s22 }
  0xc3   :  { %82 = vst [vmem:[#allocation8] sm:$0xff] %v81_v11 }
  0xc4   :  { %93 = dma.vmem_to_hbm [thread:$0]  %s89_s1, 128, %s91_s21, [#allocation5]  }
  0xc5   :  { %186 = dma.done.wait [#allocation5], 128  }
  0xc6   :  { %187 = vsyncadd [#allocation5], 4294967168 }
  0xc7   :  { %98 = vsyncpa [#allocation4], 1 }
  0xc8   :  { %99 = vsyncpa [#allocation7], 1 }
  0xc9   :  { %100 = vsyncpa [#allocation5], 1 }

</bundles_post_ra>
